<compile_context>
chip_gen: v7x
topology: tpu7x:2x2x1
jax: 0.10.0
libtpu: 0.0.40
codegen_flags: <defaults>
</compile_context>

<pallas_src>
import functools

import jax
import jax.numpy as jnp
from jax.experimental import pallas as pl
from jax.experimental.pallas import tpu as pltpu


def _round_up(x, m):
    return ((x + m - 1) // m) * m


# ---------------------------------------------------------------------------
# Kernel
# ---------------------------------------------------------------------------
def _bert_output_kernel(h_ref, res_ref, w_ref, p_ref, o_ref, *, eps, mm_dtype):
    # In-kernel cast to the matmul dtype (no-op if activations are already bf16).
    a = h_ref[...].astype(mm_dtype)
    # Dense: [tm, I] @ [I, H] -> [tm, H] on the MXU, f32 accumulation.
    x = jnp.dot(a, w_ref[...], preferred_element_type=jnp.float32)

    params = p_ref[...]                      # (8, H) f32; rows 0/1/2 = bias/gamma/beta
    bias = params[0:1, :]
    gamma = params[1:2, :]
    beta = params[2:3, :]

    x = x + bias                             # bias broadcast (1, H)
    # Dropout is identity in eval/inference mode.
    x = x + res_ref[...].astype(jnp.float32)  # residual add

    # LayerNorm over the last (hidden) axis — two-pass form for numerical safety.
    inv_h = 1.0 / float(x.shape[-1])         # Python constant -> VPU multiply
    mean = jnp.sum(x, axis=-1, keepdims=True) * inv_h
    centered = x - mean
    var = jnp.sum(centered * centered, axis=-1, keepdims=True) * inv_h
    y = centered * jax.lax.rsqrt(var + eps) * gamma + beta
    o_ref[...] = y.astype(o_ref.dtype)


# ---------------------------------------------------------------------------
# One-time parameter preparation (hoisted out of the forward call)
# ---------------------------------------------------------------------------
def prepare_bert_output_params(weight, bias, gamma, beta, *, mm_dtype=jnp.bfloat16):
    """weight: [I, H] (y = x @ W).  Returns (w_prepped, params) for bert_output()."""
    I, H = weight.shape
    w_prepped = weight.astype(mm_dtype)
    params = jnp.zeros((8, H), jnp.float32)                   # sublane-aligned block
    params = params.at[0].set(bias.astype(jnp.float32))
    params = params.at[1].set(gamma.astype(jnp.float32))
    params = params.at[2].set(beta.astype(jnp.float32))
    return w_prepped, params


# ---------------------------------------------------------------------------
# Forward wrapper
# ---------------------------------------------------------------------------
def bert_output(hidden_states, input_tensor, w_prepped, params, *, eps=1e-12,
                tm=512, vmem_limit_bytes=None):
    """hidden_states: [M, I], input_tensor: [M, H], w_prepped: [I, H] (pre-cast),
    params: [8, H] f32 (rows 0/1/2 = bias/gamma/beta).  y = LN(x @ W + b + res)."""
    M, I = hidden_states.shape
    M2, H = input_tensor.shape
    assert M2 == M and w_prepped.shape == (I, H) and params.shape == (8, H)

    out_dtype = input_tensor.dtype
    mm_dtype = w_prepped.dtype

    # Row tile: multiple of 8 sublanes, no bigger than needed, and >= 2 grid steps
    # when possible so both v7x TensorCores get work on the parallel M axis.
    tm_eff = min(tm, _round_up(M, 8))
    tm_eff = max(8, (tm_eff // 8) * 8)
    if M > 8 and pl.cdiv(M, tm_eff) < 2:
        tm_eff = _round_up(pl.cdiv(M, 2), 8)
    grid = (pl.cdiv(M, tm_eff),)

    # Footprint-sized VMEM limit (conservative: weight counted double-buffered).
    if vmem_limit_bytes is None:
        w_bytes = 2 * I * H * jnp.dtype(mm_dtype).itemsize
        act_bytes = 2 * tm_eff * I * jnp.dtype(hidden_states.dtype).itemsize
        res_bytes = 2 * tm_eff * H * jnp.dtype(input_tensor.dtype).itemsize
        out_bytes = 2 * tm_eff * H * jnp.dtype(out_dtype).itemsize
        par_bytes = 2 * 8 * H * 4
        need = w_bytes + act_bytes + res_bytes + out_bytes + par_bytes
        vmem_limit_bytes = max(int(need * 1.25) + (4 << 20), 16 << 20)

    kernel = functools.partial(_bert_output_kernel, eps=float(eps), mm_dtype=mm_dtype)

    cost = pl.CostEstimate(
        flops=2 * M * I * H,
        transcendentals=M,                   # one rsqrt per row
        bytes_accessed=(hidden_states.size * jnp.dtype(hidden_states.dtype).itemsize
                        + input_tensor.size * jnp.dtype(input_tensor.dtype).itemsize
                        + w_prepped.size * jnp.dtype(mm_dtype).itemsize
                        + params.size * 4
                        + M * H * jnp.dtype(out_dtype).itemsize),
    )

    def _call(single_buffer_resident):
        def resident(shape):
            idx = lambda i: (0,) * len(shape)
            if single_buffer_resident:
                try:
                    # Invariant blocks: fetched once, no need for a second VMEM copy.
                    return pl.BlockSpec(shape, idx, pipeline_mode=pl.Buffered(1))
                except TypeError:
                    pass
            return pl.BlockSpec(shape, idx)

        return pl.pallas_call(
            kernel,
            out_shape=jax.ShapeDtypeStruct((M, H), out_dtype),
            grid_spec=pltpu.PrefetchScalarGridSpec(
                num_scalar_prefetch=0,
                grid=grid,
                in_specs=[
                    pl.BlockSpec((tm_eff, I), lambda i: (i, 0)),   # activation tile
                    pl.BlockSpec((tm_eff, H), lambda i: (i, 0)),   # residual tile
                    resident((I, H)),                              # dense weight
                    resident((8, H)),                              # bias/gamma/beta
                ],
                out_specs=pl.BlockSpec((tm_eff, H), lambda i: (i, 0)),
            ),
            compiler_params=pltpu.CompilerParams(
                dimension_semantics=("parallel",),
                vmem_limit_bytes=vmem_limit_bytes,
            ),
            cost_estimate=cost,
        )(hidden_states, input_tensor, w_prepped, params)

    try:
        return _call(True)
    except Exception:  # conservative fallback if Buffered(1) is rejected by this jax
        return _call(False)


# ---------------------------------------------------------------------------
# References
# ---------------------------------------------------------------------------
def bert_output_ref(hidden_states, input_tensor, weight, bias, gamma, beta,
                    eps=1e-12, mm_dtype=jnp.float32):
    x = jnp.dot(hidden_states.astype(mm_dtype), weight.astype(mm_dtype),
                preferred_element_type=jnp.float32)
    x = x + bias.astype(jnp.float32)
    x = x + input_tensor.astype(jnp.float32)
    mean = jnp.mean(x, axis=-1, keepdims=True)
    var = jnp.mean((x - mean) ** 2, axis=-1, keepdims=True)
    return (x - mean) * jax.lax.rsqrt(var + eps) * gamma + beta


if __name__ == "__main__":
    # Config: batch=2, seq=8, hidden=32, intermediate=64
    B, S, H, I = 2, 8, 32, 64
    eps = 1e-12

    key = jax.random.PRNGKey(0)
    k1, k2, k3, k4 = jax.random.split(key, 4)

    hidden_states = jax.random.normal(k1, (B, S, I), dtype=jnp.float32)
    input_tensor = jax.random.normal(k2, (B, S, H), dtype=jnp.float32)

    # Deterministic parameter init (synthetic, not a checkpoint load).
    weight = jax.random.normal(k3, (I, H), dtype=jnp.float32) * 0.02  # [in, out]
    bias = jax.random.normal(k4, (H,), dtype=jnp.float32) * 0.02
    gamma = jnp.ones((H,), dtype=jnp.float32)
    beta = jnp.zeros((H,), dtype=jnp.float32)

    # One-time parameter preparation (done once at model init, not per forward).
    w_prepped, params = prepare_bert_output_params(weight, bias, gamma, beta)

    # Flatten tokens for the kernel, reshape back after.
    h2 = hidden_states.reshape(B * S, I)
    r2 = input_tensor.reshape(B * S, H)

    out = bert_output(h2, r2, w_prepped, params, eps=eps)
    out = out.reshape(B, S, H)
    jax.block_until_ready(out)

    # Check vs a matched bf16-matmul reference (tight) ...
    ref_bf16 = bert_output_ref(h2, r2, weight, bias, gamma, beta, eps=eps,
                               mm_dtype=jnp.bfloat16).reshape(B, S, H)
    assert jnp.allclose(out, ref_bf16, atol=2e-3, rtol=2e-3), "mismatch vs bf16 reference"

    # ... and vs the true f32 PyTorch-equivalent reference (loose, bf16 matmul error).
    ref_f32 = bert_output_ref(h2, r2, weight, bias, gamma, beta, eps=eps,
                              mm_dtype=jnp.float32).reshape(B, S, H)
    assert jnp.allclose(out, ref_f32, atol=3e-2, rtol=3e-2), "mismatch vs f32 reference"

    print("KERNEL_OK")
</pallas_src>

<mosaic_0001>
module attributes {stable_mosaic.version = 11 : i64} {
  func.func @_bert_output_kernel(%arg0: i32, %arg1: memref<8x64xf32, #tpu.memory_space<vmem>>, %arg2: memref<8x32xf32, #tpu.memory_space<vmem>>, %arg3: memref<64x32xbf16, #tpu.memory_space<vmem>>, %arg4: memref<8x32xf32, #tpu.memory_space<vmem>>, %arg5: memref<8x32xf32, #tpu.memory_space<vmem>>) attributes {dimension_semantics = [#tpu.dimension_semantics<parallel>], iteration_bounds = array<i64: 2>, scalar_prefetch = 0 : i64, scratch_operands = 0 : i64, tpu.core_type = #tpu.core_type<tc>, window_params = [{transform_indices = @transform_0, window_bounds = array<i64: 8, 64>}, {transform_indices = @transform_1, window_bounds = array<i64: 8, 32>}, {pipeline_mode = #tpu.pipeline_mode<synchronous>, transform_indices = @transform_2, window_bounds = array<i64: 64, 32>}, {pipeline_mode = #tpu.pipeline_mode<synchronous>, transform_indices = @transform_3, window_bounds = array<i64: 8, 32>}, {transform_indices = @transform_4, window_bounds = array<i64: 8, 32>}]} {
    %c0 = arith.constant 0 : index
    %c0_0 = arith.constant 0 : index
    %0 = vector.load %arg1[%c0, %c0_0] : memref<8x64xf32, #tpu.memory_space<vmem>>, vector<8x64xf32>
    %1 = arith.truncf %0 : vector<8x64xf32> to vector<8x64xbf16>
    %c0_1 = arith.constant 0 : index
    %c0_2 = arith.constant 0 : index
    %2 = vector.load %arg3[%c0_1, %c0_2] : memref<64x32xbf16, #tpu.memory_space<vmem>>, vector<64x32xbf16>
    %cst = arith.constant dense<0.000000e+00> : vector<8x32xf32>
    %3 = tpu.matmul %1, %2, %cst {dimension_numbers = #tpu.dot_dimension_numbers<[1], [0], [0], [1], [0, 0, 1, 1], [], []>} : vector<8x64xbf16>, vector<64x32xbf16>, vector<8x32xf32> -> vector<8x32xf32>
    %c0_3 = arith.constant 0 : index
    %c0_4 = arith.constant 0 : index
    %4 = vector.load %arg4[%c0_3, %c0_4] : memref<8x32xf32, #tpu.memory_space<vmem>>, vector<8x32xf32>
    %5 = vector.extract_strided_slice %4 {offsets = [0, 0], sizes = [1, 32], strides = [1, 1]} : vector<8x32xf32> to vector<1x32xf32>
    %6 = vector.extract_strided_slice %4 {offsets = [1, 0], sizes = [1, 32], strides = [1, 1]} : vector<8x32xf32> to vector<1x32xf32>
    %7 = vector.extract_strided_slice %4 {offsets = [2, 0], sizes = [1, 32], strides = [1, 1]} : vector<8x32xf32> to vector<1x32xf32>
    %8 = vector.broadcast %5 : vector<1x32xf32> to vector<8x32xf32>
    %9 = arith.addf %3, %8 : vector<8x32xf32>
    %c0_5 = arith.constant 0 : index
    %c0_6 = arith.constant 0 : index
    %10 = vector.load %arg2[%c0_5, %c0_6] : memref<8x32xf32, #tpu.memory_space<vmem>>, vector<8x32xf32>
    %11 = arith.addf %9, %10 : vector<8x32xf32>
    %cst_7 = arith.constant dense<0.000000e+00> : vector<8xf32>
    %12 = vector.multi_reduction <add>, %11, %cst_7 [1] : vector<8x32xf32> to vector<8xf32>
    %13 = vector.shape_cast %12 : vector<8xf32> to vector<8x1xf32>
    %cst_8 = arith.constant 3.125000e-02 : f32
    %14 = vector.broadcast %cst_8 : f32 to vector<8x1xf32>
    %15 = arith.mulf %13, %14 : vector<8x1xf32>
    %16 = vector.broadcast %15 : vector<8x1xf32> to vector<8x32xf32>
    %17 = arith.subf %11, %16 : vector<8x32xf32>
    %18 = arith.mulf %17, %17 : vector<8x32xf32>
    %cst_9 = arith.constant dense<0.000000e+00> : vector<8xf32>
    %19 = vector.multi_reduction <add>, %18, %cst_9 [1] : vector<8x32xf32> to vector<8xf32>
    %20 = vector.shape_cast %19 : vector<8xf32> to vector<8x1xf32>
    %cst_10 = arith.constant 3.125000e-02 : f32
    %21 = vector.broadcast %cst_10 : f32 to vector<8x1xf32>
    %22 = arith.mulf %20, %21 : vector<8x1xf32>
    %cst_11 = arith.constant 9.99999996E-13 : f32
    %23 = vector.broadcast %cst_11 : f32 to vector<8x1xf32>
    %24 = arith.addf %22, %23 : vector<8x1xf32>
    %25 = math.rsqrt %24 : vector<8x1xf32>
    %26 = vector.broadcast %25 : vector<8x1xf32> to vector<8x32xf32>
    %27 = arith.mulf %17, %26 : vector<8x32xf32>
    %28 = vector.broadcast %6 : vector<1x32xf32> to vector<8x32xf32>
    %29 = arith.mulf %27, %28 : vector<8x32xf32>
    %30 = vector.broadcast %7 : vector<1x32xf32> to vector<8x32xf32>
    %31 = arith.addf %29, %30 : vector<8x32xf32>
    %c0_12 = arith.constant 0 : index
    %c0_13 = arith.constant 0 : index
    %32 = vector.load %arg5[%c0_12, %c0_13] : memref<8x32xf32, #tpu.memory_space<vmem>>, vector<8x32xf32>
    tpu.vector_store %arg5[%c0_12, %c0_13], %31 {strides = array<i32>} : memref<8x32xf32, #tpu.memory_space<vmem>>, vector<8x32xf32>,
    return
  }
  func.func @transform_0(%arg0: i32) -> (i32, i32) {
    %c0_i32 = arith.constant 0 : i32
    %c0_i32_0 = arith.constant 0 : i32
    return %arg0, %c0_i32 : i32, i32
  }
  func.func @transform_1(%arg0: i32) -> (i32, i32) {
    %c0_i32 = arith.constant 0 : i32
    %c0_i32_0 = arith.constant 0 : i32
    return %arg0, %c0_i32 : i32, i32
  }
  func.func @transform_2(%arg0: i32) -> (i32, i32) {
    %c0_i32 = arith.constant 0 : i32
    %c0_i32_0 = arith.constant 0 : i32
    %c0_i32_1 = arith.constant 0 : i32
    return %c0_i32, %c0_i32_0 : i32, i32
  }
  func.func @transform_3(%arg0: i32) -> (i32, i32) {
    %c0_i32 = arith.constant 0 : i32
    %c0_i32_0 = arith.constant 0 : i32
    %c0_i32_1 = arith.constant 0 : i32
    return %c0_i32, %c0_i32_0 : i32, i32
  }
  func.func @transform_4(%arg0: i32) -> (i32, i32) {
    %c0_i32 = arith.constant 0 : i32
    %c0_i32_0 = arith.constant 0 : i32
    return %arg0, %c0_i32 : i32, i32
  }
}

module attributes {stable_mosaic.version = 11 : i64} {
  func.func @_bert_output_kernel(%arg0: i32, %arg1: memref<8x64xf32, #tpu.memory_space<vmem>>, %arg2: memref<8x32xf32, #tpu.memory_space<vmem>>, %arg3: memref<64x32xbf16, #tpu.memory_space<vmem>>, %arg4: memref<8x32xf32, #tpu.memory_space<vmem>>, %arg5: memref<8x32xf32, #tpu.memory_space<vmem>>) attributes {dimension_semantics = [#tpu.dimension_semantics<parallel>], iteration_bounds = array<i64: 2>, scalar_prefetch = 0 : i64, scratch_operands = 0 : i64, tpu.core_type = #tpu.core_type<tc>, window_params = [{transform_indices = @transform_0, window_bounds = array<i64: 8, 64>}, {transform_indices = @transform_1, window_bounds = array<i64: 8, 32>}, {pipeline_mode = #tpu.pipeline_mode<synchronous>, transform_indices = @transform_2, window_bounds = array<i64: 64, 32>}, {pipeline_mode = #tpu.pipeline_mode<synchronous>, transform_indices = @transform_3, window_bounds = array<i64: 8, 32>}, {transform_indices = @transform_4, window_bounds = array<i64: 8, 32>}]} {
    %c0 = arith.constant 0 : index
    %c0_0 = arith.constant 0 : index
    %0 = vector.load %arg1[%c0, %c0_0] : memref<8x64xf32, #tpu.memory_space<vmem>>, vector<8x64xf32>
    %1 = arith.truncf %0 : vector<8x64xf32> to vector<8x64xbf16>
    %c0_1 = arith.constant 0 : index
    %c0_2 = arith.constant 0 : index
    %2 = vector.load %arg3[%c0_1, %c0_2] : memref<64x32xbf16, #tpu.memory_space<vmem>>, vector<64x32xbf16>
    %cst = arith.constant dense<0.000000e+00> : vector<8x32xf32>
    %3 = tpu.matmul %1, %2, %cst {dimension_numbers = #tpu.dot_dimension_numbers<[1], [0], [0], [1], [0, 0, 1, 1], [], []>} : vector<8x64xbf16>, vector<64x32xbf16>, vector<8x32xf32> -> vector<8x32xf32>
    %c0_3 = arith.constant 0 : index
    %c0_4 = arith.constant 0 : index
    %4 = vector.load %arg4[%c0_3, %c0_4] : memref<8x32xf32, #tpu.memory_space<vmem>>, vector<8x32xf32>
    %5 = vector.extract_strided_slice %4 {offsets = [0, 0], sizes = [1, 32], strides = [1, 1]} : vector<8x32xf32> to vector<1x32xf32>
    %6 = vector.extract_strided_slice %4 {offsets = [1, 0], sizes = [1, 32], strides = [1, 1]} : vector<8x32xf32> to vector<1x32xf32>
    %7 = vector.extract_strided_slice %4 {offsets = [2, 0], sizes = [1, 32], strides = [1, 1]} : vector<8x32xf32> to vector<1x32xf32>
    %8 = vector.broadcast %5 : vector<1x32xf32> to vector<8x32xf32>
    %9 = arith.addf %3, %8 : vector<8x32xf32>
    %c0_5 = arith.constant 0 : index
    %c0_6 = arith.constant 0 : index
    %10 = vector.load %arg2[%c0_5, %c0_6] : memref<8x32xf32, #tpu.memory_space<vmem>>, vector<8x32xf32>
    %11 = arith.addf %9, %10 : vector<8x32xf32>
    %cst_7 = arith.constant dense<0.000000e+00> : vector<8xf32>
    %12 = vector.multi_reduction <add>, %11, %cst_7 [1] : vector<8x32xf32> to vector<8xf32>
    %13 = vector.shape_cast %12 : vector<8xf32> to vector<8x1xf32>
    %cst_8 = arith.constant 3.125000e-02 : f32
    %14 = vector.broadcast %cst_8 : f32 to vector<8x1xf32>
    %15 = arith.mulf %13, %14 : vector<8x1xf32>
    %16 = vector.broadcast %15 : vector<8x1xf32> to vector<8x32xf32>
    %17 = arith.subf %11, %16 : vector<8x32xf32>
    %18 = arith.mulf %17, %17 : vector<8x32xf32>
    %cst_9 = arith.constant dense<0.000000e+00> : vector<8xf32>
    %19 = vector.multi_reduction <add>, %18, %cst_9 [1] : vector<8x32xf32> to vector<8xf32>
    %20 = vector.shape_cast %19 : vector<8xf32> to vector<8x1xf32>
    %cst_10 = arith.constant 3.125000e-02 : f32
    %21 = vector.broadcast %cst_10 : f32 to vector<8x1xf32>
    %22 = arith.mulf %20, %21 : vector<8x1xf32>
    %cst_11 = arith.constant 9.99999996E-13 : f32
    %23 = vector.broadcast %cst_11 : f32 to vector<8x1xf32>
    %24 = arith.addf %22, %23 : vector<8x1xf32>
    %25 = math.rsqrt %24 : vector<8x1xf32>
    %26 = vector.broadcast %25 : vector<8x1xf32> to vector<8x32xf32>
    %27 = arith.mulf %17, %26 : vector<8x32xf32>
    %28 = vector.broadcast %6 : vector<1x32xf32> to vector<8x32xf32>
    %29 = arith.mulf %27, %28 : vector<8x32xf32>
    %30 = vector.broadcast %7 : vector<1x32xf32> to vector<8x32xf32>
    %31 = arith.addf %29, %30 : vector<8x32xf32>
    %c0_12 = arith.constant 0 : index
    %c0_13 = arith.constant 0 : index
    %32 = vector.load %arg5[%c0_12, %c0_13] : memref<8x32xf32, #tpu.memory_space<vmem>>, vector<8x32xf32>
    tpu.vector_store %arg5[%c0_12, %c0_13], %31 {strides = array<i32>} : memref<8x32xf32, #tpu.memory_space<vmem>>, vector<8x32xf32>,
    return
  }
  func.func @transform_0(%arg0: i32) -> (i32, i32) {
    %c0_i32 = arith.constant 0 : i32
    %c0_i32_0 = arith.constant 0 : i32
    return %arg0, %c0_i32 : i32, i32
  }
  func.func @transform_1(%arg0: i32) -> (i32, i32) {
    %c0_i32 = arith.constant 0 : i32
    %c0_i32_0 = arith.constant 0 : i32
    return %arg0, %c0_i32 : i32, i32
  }
  func.func @transform_2(%arg0: i32) -> (i32, i32) {
    %c0_i32 = arith.constant 0 : i32
    %c0_i32_0 = arith.constant 0 : i32
    %c0_i32_1 = arith.constant 0 : i32
    return %c0_i32, %c0_i32_0 : i32, i32
  }
  func.func @transform_3(%arg0: i32) -> (i32, i32) {
    %c0_i32 = arith.constant 0 : i32
    %c0_i32_0 = arith.constant 0 : i32
    %c0_i32_1 = arith.constant 0 : i32
    return %c0_i32, %c0_i32_0 : i32, i32
  }
  func.func @transform_4(%arg0: i32) -> (i32, i32) {
    %c0_i32 = arith.constant 0 : i32
    %c0_i32_0 = arith.constant 0 : i32
    return %arg0, %c0_i32 : i32, i32
  }
}

</mosaic_0001>

<bundles_post_ra>
// kernel: tpu_custom_call.1
= control target key start
LH: loop header
LB: loop body
LE: loop exit
PB: predicated region body
PF: predicated region fallthrough
CT: control target
= control target key end

     0   :  { %9 = vsyncpa [#allocation3], 0  ;;  %s699_s0 = inlined_call_operand.vmem [shape: f32[16,64], index: 0, kind: input, shape index: {}]   ;;  %s700_s1 = inlined_call_operand.vmem [shape: f32[16,32], index: 1, kind: input, shape index: {}]   ;;  %s701_s2 = inlined_call_operand.vmem [shape: bf16[64,32], index: 2, kind: input, shape index: {}]   ;;  %s702_s3 = inlined_call_operand.vmem [shape: f32[8,32], index: 3, kind: input, shape index: {}]   ;;  %s703_s4 = inlined_call_operand.hbm [shape: f32[16,32], index: 4, kind: output, shape index: {}]  }
   0x1   :  { %11 = vsyncpa [#allocation3 + $0x1], 0  ;;  %s578_s15 = smov 0   ;;  %s580_s16 = smov 0  }
   0x2   :  { %s582_s17 = smov 0   ;;  %s584_s18 = smov 0  }
   0x3 LB: > { %s599_s19 = sadd.s32 4294967295, %s548_s18   ;;  %s406_s20 = sadd.s32 4294967294, %s548_s18   ;;  %s548_s18 = sphi %s584_s18, %s709_s18   ;;  %s544_s17 = sphi %s582_s17, %s708_s17   ;;  %s540_s16 = sphi %s580_s16, %s707_s16   ;;  %s536_s15 = sphi %s578_s15, %s706_s15  }
   0x4   : > { %s603_s21 = sadd.s32 1, %s548_s18   ;;  %s118_s22 = sadd.s32 1, %s544_s17 }
   0x5   : > { %s115_s23 = ssub.s32 %s548_s18, %s603_s21  ;;  %p128_p0 = scmp.ne.s32.totalorder %s544_s17, %s540_s16 }
   0x6   : > { %p116_p1 = scmp.eq.s32.totalorder %s115_s23, 0  ;;  %p129_p2 = scmp.eq.s32.totalorder %s599_s19, 1 }
   0x7   : > { %p134_p3 = scmp.ne.s32.totalorder %s540_s16, %s536_s15  ;;  %p135_p4 = scmp.eq.s32.totalorder %s406_s20, 1 }
   0x8   : > { %s614_s24 = scalar_select %p116_p1, %s544_s17, %s118_s22  }
   0x9   : > { %p616_p5 = por %p129_p2, %p128_p0  ;;  %p620_p6 = por %p135_p4, %p134_p3 }
   0xa   : > { %p409_p7 = scmp.ge.s32.totalorder %s548_s18, 1  ;;  %p173_p8 = scmp.lt.s32.totalorder %s548_s18, 3 }
   0xc   : > { %p174_p9 = pnand %p409_p7, %p173_p8 }
   0xd   : > { %v480_v0 = vld [vmem:[%s701_s2] sm:$0xff] (!%p174_p9)   ;;  %v550_v1 = vmov (!%p174_p9), 0.0   ;;  %v481_v2 = vld [vmem:[%s701_s2 + $0x8] sm:$0xff] (!%p174_p9)   ;;  %vm551_vm0 = vmmov (!%p174_p9), 0   ;;  %p202_p10 = scmp.lt.s32.totalorder (!%p174_p9), %s599_s19, 1  ;;  %v482_v3 = vld [vmem:[%s701_s2 + $0x10] sm:$0xff] (!%p174_p9)   ;;  %v222_v7 = vlaneseq (!%p174_p9) }
   0xe   : > { %177 = sbr.rel (%p174_p9) target bundleno = 573 (0x23d), region = 36  ;;  %427 = vmatprep.subr.bf16.mxu0 (!%p174_p9), %v550_v1  ;;  %435 = vmatprep.mubr.msk.bf16.mxu0 (!%p174_p9), %vm551_vm0, %v550_v1  ;;  %v483_v4 = vld [vmem:[%s701_s2 + $0x18] sm:$0xff] (!%p174_p9)   ;;  %vm250_vm1 = vcmask (!%p174_p9), 523264   ;;  %v221_v10 = vld [vmem:[%s702_s3] sm:$0xff] (!%p174_p9)  ;;  %vm296_vm2 = vcmask (!%p174_p9), 261120   ;;  %s199_s28 = sand.u32 (!%p174_p9), 1, %s540_s16  }
   0xf   : > { %428 = vmatpush3.bf16.msra.mxu0 (!%p174_p9), %v480_v0  ;;  %v223_v8 = vshrl.u32 (!%p174_p9), %v222_v7, 7  ;;  %s410_s29 = sshll.u32 (!%p174_p9), %s199_s28, 3  ;;  %s419_s30 = sshll.u32 (!%p174_p9), %s599_s19, 7 }
  0x10   : > { %429 = vmatprep.subr.bf16.mxu0 (!%p174_p9), %v550_v1  ;;  %s656_s9 = scalar_lea.hbm (!%p174_p9), %s703_s4, %s419_s30  ;;  %s322_s10 = scalar_lea.sflag (!%p174_p9), [#allocation3], %s199_s28 }
  0x11   : > { %v224_v9 = vsub.s32 (!%p174_p9), 0, %v223_v8  ;;  %v312_v28 = vsub.s32 (!%p174_p9), 1, %v223_v8  ;;  %v317_v29 = vsub.s32 (!%p174_p9), 2, %v223_v8 }
  0x13   : > { %430 = vmatpush3.bf16.msra.mxu0 (!%p174_p9), %v481_v2  ;;  %v225_v11 = vrot.slane (!%p174_p9), %v221_v10, %v224_v9  ;;  %v313_v30 = vrot.slane (!%p174_p9), %v221_v10, %v312_v28  ;;  %v318_v32 = vrot.slane (!%p174_p9), %v221_v10, %v317_v29 }
  0x14   : > { %431 = vmatprep.subr.bf16.mxu0 (!%p174_p9), %v550_v1 }
  0x15   : > { %s203_s5 = scalar_select %p202_p10, %s599_s19, 1 }
  0x16   : > { %s552_s19 = smov [#allocation2]  }
  0x17   : > { %s411_s8 = sshll.u32 %s203_s5, 3  ;;  %432 = vmatpush3.bf16.msra.mxu0 %v482_v3  ;;  %s201_s5 = scalar_lea.vmem [#allocation2], %s410_s29 }
  0x18   : > { %s205_s11 = scalar_lea.vmem %s699_s0, %s411_s8  ;;  %433 = vmatprep.subr.bf16.mxu0 %v550_v1  ;;  %s209_s27 = scalar_lea.vmem %s700_s1, %s411_s8 }
  0x19   : > { %v211_v5 = vld [vmem:[%s205_s11] sm:$0xff]  ;;  %s335_s6 = sshll.u32 %s201_s5, 4  ;;  %s490_s12 = sshll.u32 %s552_s19, 4  ;;  %s658_s6 = int_to_ptr.vmem [resolvable:$true] %s335_s6  ;;  %s491_s12 = int_to_ptr.vmem [resolvable:$false] %s490_s12 }
  0x1a   : > { %v212_v6 = vpack.c.bf16 %v211_v5, %v211_v5  ;;  %v294_v13 = vld [vmem:[%s209_s27] sm:$0xff]  ;;  %s486_s11 = scalar_lea.vmem %s658_s6, 128  ;;  %s492_s13 = scalar_lea.vmem %s491_s12, 256 }
  0x1b   : > { %434 = vmatpush3.bf16.msra.mxu0 %v483_v4  ;;  %p487_p11 = scmp.ne.s32.totalorder %s658_s6, %s486_s11  ;;  %p493_p0 = scmp.lt.s32.totalorder %s658_s6, %s491_s12 }
  0x1c   : > { %p494_p1 = scmp.lt.s32.totalorder %s492_s13, %s486_s11 }
  0x1d   : > { %p488_p12 = pnand %p487_p11, %p616_p5 }
  0x1e   : > { %436 = vmatmul.mubr.msk.bf16.vlgmr.msra.gmra.mrb[0].mxu0 %vm250_vm1, %v212_v6  ;;  %p495_p2 = por %p494_p1, %p493_p0 }
  0x1f   : > { %p489_p13 = pneg %p488_p12 }
  0x21   : > { %p496_p3 = pnand %p495_p2, %p489_p13 }
  0xf1   : > { %v288_v12 = vpop.f32.mrb[0].mxu0 }
  0xf2   : > { %v289_v14 = vadd.f32 %v288_v12, %v225_v11  ;;  %v437_v15 = vpop.f32.mrb[1].mxu0 }
  0xf3   : > { %v291_v16 = vpop.f32.mrb[2].mxu0 }
  0xf4   : > { %v438_v17 = vpop.f32.mrb[3].mxu0  ;;  %v295_v18 = vadd.f32 %v294_v13, %v289_v14 }
  0xf6   : > { %v297_v19 = vsel %vm296_vm2, %v295_v18, 0.0 }
  0xf7   : > { %298 = vadd.xlane.f32.xlu0 %v297_v19 }
 0x184   : > { %v299_v20 = vpop.xlane.xlu0 %298 }
 0x185   : > { %v300_v21 = vmul.f32 0.03125, %v299_v20 }
 0x187   : > { %v301_v22 = vsub.f32 %v295_v18, %v300_v21 }
 0x189   : > { %v302_v23 = vmul.f32 %v301_v22, %v301_v22 }
 0x18b   : > { %v303_v24 = vsel %vm296_vm2, %v302_v23, 0.0 }
 0x18c   : > { %304 = vadd.xlane.f32.xlu0 %v303_v24 }
 0x219   : > { %v305_v25 = vpop.xlane.xlu0 %304 }
 0x21a   : > { %v306_v26 = vmul.f32 0.03125, %v305_v25 }
 0x21c   : > { %v307_v27 = vadd.f32 1e-12, %v306_v26 }
 0x21e   : > { %484 = vrsqrt.f32 %v307_v27 }
 0x228   : > { %v485_v31 = vpop.eup %484 }
 0x229   : > { %v309_v33 = vmul.f32 %v485_v31, %v301_v22 }
 0x22b   : > { %v314_v34 = vmul.f32 %v313_v30, %v309_v33 }
 0x22d   : > { %v319_v35 = vadd.f32 %v318_v32, %v314_v34 }
 0x22f   : > { %320 = vst.msk [vmem:[%s201_s5] sm:$0xff] %vm296_vm2, %v319_v35 }
 0x230   : > { %499 = shalt.err (!%p496_p3)
}
 0x231   : > { %s500_s14 = scalar_lea.hbm %s656_s9, 128  ;;  %s504_s23 = scalar_lea.hbm %s703_s4, 256 }
 0x232   : > { %p501_p4 = scmp.ne.s32.totalorder %s656_s9, %s500_s14  ;;  %p505_p9 = scmp.lt.u32.totalorder %s656_s9, %s703_s4 }
 0x233   : > { %p506_p10 = scmp.lt.u32.totalorder %s504_s23, %s500_s14  ;;  %p508_p12 = scmp.lt.u32.totalorder %s500_s14, %s656_s9 }
 0x234   : > { %p502_p7 = pnand %p501_p4, %p616_p5 }
 0x235   : > { %p507_p11 = por %p506_p10, %p505_p9 }
 0x236   : > { %p503_p8 = pneg %p502_p7 }
 0x237   : > { %p509_p13 = por %p508_p12, %p507_p11 }
 0x239   : > { %p510_p0 = pnand %p509_p13, %p503_p8 }
 0x23b   : > { %513 = shalt.err (!%p510_p0)
}
 0x23c   : > { %439 = dma.vmem_to_hbm [thread:$0]  (%p616_p5), %s658_s6, 128, %s656_s9, %s322_s10  }
 0x23d PF: > { %p445_p1 = scmp.ge.s32.totalorder %s548_s18, 2  ;;  %s347_s29 = sand.u32 1, %s536_s15  }
 0x23e   : > { %s348_s30 = scalar_lea.sflag [#allocation3], %s347_s29 }
 0x23f   : > { %p442_p2 = pnand %p445_p1, %p620_p6 }
 0x241   : > { %531 = dma.done.wait (!%p442_p2), %s348_s30, 128  }
 0x242   : > { %533 = vsyncadd (!%p442_p2), %s348_s30, 4294967168  ;;  %p14_p3 = scmp.ge.s32.totalorder %s603_s21, 4   ;;  %s706_s15 = smov %s540_s16 }
 0x243   : > { %s707_s16 = smov %s544_s17  ;;  %s708_s17 = smov %s614_s24 }
 0x244   : > { %s709_s18 = smov %s603_s21  ;;  %16 = sbr.rel (!%p14_p3) target bundleno = 3 (0x3), region = 74 }
 0x24b   :  { %353 = vsyncpa [#allocation3], 1 }
 0x24c   :  { %355 = vsyncpa [#allocation3 + $0x1], 1 }

// kernel: tpu_custom_call.1
= control target key start
LH: loop header
LB: loop body
LE: loop exit
PB: predicated region body
PF: predicated region fallthrough
CT: control target
= control target key end

     0   :  { %9 = vsyncpa [#allocation3], 0  ;;  %s699_s0 = inlined_call_operand.vmem [shape: f32[16,64], index: 0, kind: input, shape index: {}]   ;;  %s700_s1 = inlined_call_operand.vmem [shape: f32[16,32], index: 1, kind: input, shape index: {}]   ;;  %s701_s2 = inlined_call_operand.vmem [shape: bf16[64,32], index: 2, kind: input, shape index: {}]   ;;  %s702_s3 = inlined_call_operand.vmem [shape: f32[8,32], index: 3, kind: input, shape index: {}]   ;;  %s703_s4 = inlined_call_operand.hbm [shape: f32[16,32], index: 4, kind: output, shape index: {}]  }
   0x1   :  { %11 = vsyncpa [#allocation3 + $0x1], 0  ;;  %s578_s15 = smov 0   ;;  %s580_s16 = smov 0  }
   0x2   :  { %s582_s17 = smov 0   ;;  %s584_s18 = smov 0  }
   0x3 LB: > { %s599_s19 = sadd.s32 4294967295, %s548_s18   ;;  %s406_s20 = sadd.s32 4294967294, %s548_s18   ;;  %s548_s18 = sphi %s584_s18, %s709_s18   ;;  %s544_s17 = sphi %s582_s17, %s708_s17   ;;  %s540_s16 = sphi %s580_s16, %s707_s16   ;;  %s536_s15 = sphi %s578_s15, %s706_s15  }
   0x4   : > { %s603_s21 = sadd.s32 1, %s548_s18   ;;  %s118_s22 = sadd.s32 1, %s544_s17 }
   0x5   : > { %s115_s23 = ssub.s32 %s548_s18, %s603_s21  ;;  %p128_p0 = scmp.ne.s32.totalorder %s544_s17, %s540_s16 }
   0x6   : > { %p116_p1 = scmp.eq.s32.totalorder %s115_s23, 0  ;;  %p129_p2 = scmp.eq.s32.totalorder %s599_s19, 1 }
   0x7   : > { %p134_p3 = scmp.ne.s32.totalorder %s540_s16, %s536_s15  ;;  %p135_p4 = scmp.eq.s32.totalorder %s406_s20, 1 }
   0x8   : > { %s614_s24 = scalar_select %p116_p1, %s544_s17, %s118_s22  }
   0x9   : > { %p616_p5 = por %p129_p2, %p128_p0  ;;  %p620_p6 = por %p135_p4, %p134_p3 }
   0xa   : > { %p409_p7 = scmp.ge.s32.totalorder %s548_s18, 1  ;;  %p173_p8 = scmp.lt.s32.totalorder %s548_s18, 3 }
   0xc   : > { %p174_p9 = pnand %p409_p7, %p173_p8 }
   0xd   : > { %v480_v0 = vld [vmem:[%s701_s2] sm:$0xff] (!%p174_p9)   ;;  %v550_v1 = vmov (!%p174_p9), 0.0   ;;  %v481_v2 = vld [vmem:[%s701_s2 + $0x8] sm:$0xff] (!%p174_p9)   ;;  %vm551_vm0 = vmmov (!%p174_p9), 0   ;;  %p202_p10 = scmp.lt.s32.totalorder (!%p174_p9), %s599_s19, 1  ;;  %v482_v3 = vld [vmem:[%s701_s2 + $0x10] sm:$0xff] (!%p174_p9)   ;;  %v222_v7 = vlaneseq (!%p174_p9) }
   0xe   : > { %177 = sbr.rel (%p174_p9) target bundleno = 573 (0x23d), region = 36  ;;  %427 = vmatprep.subr.bf16.mxu0 (!%p174_p9), %v550_v1  ;;  %435 = vmatprep.mubr.msk.bf16.mxu0 (!%p174_p9), %vm551_vm0, %v550_v1  ;;  %v483_v4 = vld [vmem:[%s701_s2 + $0x18] sm:$0xff] (!%p174_p9)   ;;  %vm250_vm1 = vcmask (!%p174_p9), 523264   ;;  %v221_v10 = vld [vmem:[%s702_s3] sm:$0xff] (!%p174_p9)  ;;  %vm296_vm2 = vcmask (!%p174_p9), 261120   ;;  %s199_s28 = sand.u32 (!%p174_p9), 1, %s540_s16  }
   0xf   : > { %428 = vmatpush3.bf16.msra.mxu0 (!%p174_p9), %v480_v0  ;;  %v223_v8 = vshrl.u32 (!%p174_p9), %v222_v7, 7  ;;  %s410_s29 = sshll.u32 (!%p174_p9), %s199_s28, 3  ;;  %s419_s30 = sshll.u32 (!%p174_p9), %s599_s19, 7 }
  0x10   : > { %429 = vmatprep.subr.bf16.mxu0 (!%p174_p9), %v550_v1  ;;  %s656_s9 = scalar_lea.hbm (!%p174_p9), %s703_s4, %s419_s30  ;;  %s322_s10 = scalar_lea.sflag (!%p174_p9), [#allocation3], %s199_s28 }
  0x11   : > { %v224_v9 = vsub.s32 (!%p174_p9), 0, %v223_v8  ;;  %v312_v28 = vsub.s32 (!%p174_p9), 1, %v223_v8  ;;  %v317_v29 = vsub.s32 (!%p174_p9), 2, %v223_v8 }
  0x13   : > { %430 = vmatpush3.bf16.msra.mxu0 (!%p174_p9), %v481_v2  ;;  %v225_v11 = vrot.slane (!%p174_p9), %v221_v10, %v224_v9  ;;  %v313_v30 = vrot.slane (!%p174_p9), %v221_v10, %v312_v28  ;;  %v318_v32 = vrot.slane (!%p174_p9), %v221_v10, %v317_v29 }
  0x14   : > { %431 = vmatprep.subr.bf16.mxu0 (!%p174_p9), %v550_v1 }
  0x15   : > { %s203_s5 = scalar_select %p202_p10, %s599_s19, 1 }
  0x16   : > { %s552_s19 = smov [#allocation2]  }
  0x17   : > { %s411_s8 = sshll.u32 %s203_s5, 3  ;;  %432 = vmatpush3.bf16.msra.mxu0 %v482_v3  ;;  %s201_s5 = scalar_lea.vmem [#allocation2], %s410_s29 }
  0x18   : > { %s205_s11 = scalar_lea.vmem %s699_s0, %s411_s8  ;;  %433 = vmatprep.subr.bf16.mxu0 %v550_v1  ;;  %s209_s27 = scalar_lea.vmem %s700_s1, %s411_s8 }
  0x19   : > { %v211_v5 = vld [vmem:[%s205_s11] sm:$0xff]  ;;  %s335_s6 = sshll.u32 %s201_s5, 4  ;;  %s490_s12 = sshll.u32 %s552_s19, 4  ;;  %s658_s6 = int_to_ptr.vmem [resolvable:$true] %s335_s6  ;;  %s491_s12 = int_to_ptr.vmem [resolvable:$false] %s490_s12 }
  0x1a   : > { %v212_v6 = vpack.c.bf16 %v211_v5, %v211_v5  ;;  %v294_v13 = vld [vmem:[%s209_s27] sm:$0xff]  ;;  %s486_s11 = scalar_lea.vmem %s658_s6, 128  ;;  %s492_s13 = scalar_lea.vmem %s491_s12, 256 }
  0x1b   : > { %434 = vmatpush3.bf16.msra.mxu0 %v483_v4  ;;  %p487_p11 = scmp.ne.s32.totalorder %s658_s6, %s486_s11  ;;  %p493_p0 = scmp.lt.s32.totalorder %s658_s6, %s491_s12 }
  0x1c   : > { %p494_p1 = scmp.lt.s32.totalorder %s492_s13, %s486_s11 }
  0x1d   : > { %p488_p12 = pnand %p487_p11, %p616_p5 }
  0x1e   : > { %436 = vmatmul.mubr.msk.bf16.vlgmr.msra.gmra.mrb[0].mxu0 %vm250_vm1, %v212_v6  ;;  %p495_p2 = por %p494_p1, %p493_p0 }
  0x1f   : > { %p489_p13 = pneg %p488_p12 }
  0x21   : > { %p496_p3 = pnand %p495_p2, %p489_p13 }
  0xf1   : > { %v288_v12 = vpop.f32.mrb[0].mxu0 }
  0xf2   : > { %v289_v14 = vadd.f32 %v288_v12, %v225_v11  ;;  %v437_v15 = vpop.f32.mrb[1].mxu0 }
  0xf3   : > { %v291_v16 = vpop.f32.mrb[2].mxu0 }
  0xf4   : > { %v438_v17 = vpop.f32.mrb[3].mxu0  ;;  %v295_v18 = vadd.f32 %v294_v13, %v289_v14 }
  0xf6   : > { %v297_v19 = vsel %vm296_vm2, %v295_v18, 0.0 }
  0xf7   : > { %298 = vadd.xlane.f32.xlu0 %v297_v19 }
 0x184   : > { %v299_v20 = vpop.xlane.xlu0 %298 }
 0x185   : > { %v300_v21 = vmul.f32 0.03125, %v299_v20 }
 0x187   : > { %v301_v22 = vsub.f32 %v295_v18, %v300_v21 }
 0x189   : > { %v302_v23 = vmul.f32 %v301_v22, %v301_v22 }
 0x18b   : > { %v303_v24 = vsel %vm296_vm2, %v302_v23, 0.0 }
 0x18c   : > { %304 = vadd.xlane.f32.xlu0 %v303_v24 }
 0x219   : > { %v305_v25 = vpop.xlane.xlu0 %304 }
 0x21a   : > { %v306_v26 = vmul.f32 0.03125, %v305_v25 }
 0x21c   : > { %v307_v27 = vadd.f32 1e-12, %v306_v26 }
 0x21e   : > { %484 = vrsqrt.f32 %v307_v27 }
 0x228   : > { %v485_v31 = vpop.eup %484 }
 0x229   : > { %v309_v33 = vmul.f32 %v485_v31, %v301_v22 }
 0x22b   : > { %v314_v34 = vmul.f32 %v313_v30, %v309_v33 }
 0x22d   : > { %v319_v35 = vadd.f32 %v318_v32, %v314_v34 }
 0x22f   : > { %320 = vst.msk [vmem:[%s201_s5] sm:$0xff] %vm296_vm2, %v319_v35 }
 0x230   : > { %499 = shalt.err (!%p496_p3)
}
 0x231   : > { %s500_s14 = scalar_lea.hbm %s656_s9, 128  ;;  %s504_s23 = scalar_lea.hbm %s703_s4, 256 }
 0x232   : > { %p501_p4 = scmp.ne.s32.totalorder %s656_s9, %s500_s14  ;;  %p505_p9 = scmp.lt.u32.totalorder %s656_s9, %s703_s4 }
 0x233   : > { %p506_p10 = scmp.lt.u32.totalorder %s504_s23, %s500_s14  ;;  %p508_p12 = scmp.lt.u32.totalorder %s500_s14, %s656_s9 }
 0x234   : > { %p502_p7 = pnand %p501_p4, %p616_p5 }
 0x235   : > { %p507_p11 = por %p506_p10, %p505_p9 }
 0x236   : > { %p503_p8 = pneg %p502_p7 }
 0x237   : > { %p509_p13 = por %p508_p12, %p507_p11 }
 0x239   : > { %p510_p0 = pnand %p509_p13, %p503_p8 }
 0x23b   : > { %513 = shalt.err (!%p510_p0)
}
 0x23c   : > { %439 = dma.vmem_to_hbm [thread:$0]  (%p616_p5), %s658_s6, 128, %s656_s9, %s322_s10  }
 0x23d PF: > { %p445_p1 = scmp.ge.s32.totalorder %s548_s18, 2  ;;  %s347_s29 = sand.u32 1, %s536_s15  }
 0x23e   : > { %s348_s30 = scalar_lea.sflag [#allocation3], %s347_s29 }
 0x23f   : > { %p442_p2 = pnand %p445_p1, %p620_p6 }
 0x241   : > { %531 = dma.done.wait (!%p442_p2), %s348_s30, 128  }
 0x242   : > { %533 = vsyncadd (!%p442_p2), %s348_s30, 4294967168  ;;  %p14_p3 = scmp.ge.s32.totalorder %s603_s21, 4   ;;  %s706_s15 = smov %s540_s16 }
 0x243   : > { %s707_s16 = smov %s544_s17  ;;  %s708_s17 = smov %s614_s24 }
 0x244   : > { %s709_s18 = smov %s603_s21  ;;  %16 = sbr.rel (!%p14_p3) target bundleno = 3 (0x3), region = 74 }
 0x24b   :  { %353 = vsyncpa [#allocation3], 1 }
 0x24c   :  { %355 = vsyncpa [#allocation3 + $0x1], 1 }

</bundles_post_ra>
